<compile_context>
chip_gen: v7x
topology: tpu7x:2x2x1
jax: 0.10.0
libtpu: 0.0.40
codegen_flags: <defaults>
</compile_context>

<pallas_src>
import jax
import jax.numpy as jnp
from jax.experimental import pallas as pl
from jax.experimental.pallas import tpu as pltpu


def _round_up(x, m):
    return ((x + m - 1) // m) * m


def d2_kernel(x_ref, w1_ref, b1_ref, w2_ref, b2_ref, w3_ref, b3_ref,
              w4_ref, b4_ref, o_ref):
    """Full 4-layer MLP + softmax for one batch tile, entirely in VMEM.

    Matmuls run at the weight dtype (f32 or bf16) with f32 MXU accumulation;
    bias / ReLU / softmax always in f32. The output is stored transposed as
    (unit_pad, batch_tile): lane axis = batch -> dense unmasked stores and a
    16x smaller HBM writeback than a 128-lane padded probability block.
    """
    wdt = w1_ref.dtype
    h = x_ref[...]

    h = jnp.dot(h.astype(wdt), w1_ref[...],
                preferred_element_type=jnp.float32) + b1_ref[...]
    h = jnp.maximum(h, 0.0)

    h = jnp.dot(h.astype(wdt), w2_ref[...],
                preferred_element_type=jnp.float32) + b2_ref[...]
    h = jnp.maximum(h, 0.0)

    h = jnp.dot(h.astype(wdt), w3_ref[...],
                preferred_element_type=jnp.float32) + b3_ref[...]
    h = jnp.maximum(h, 0.0)

    logits = jnp.dot(h.astype(wdt), w4_ref[...],
                     preferred_element_type=jnp.float32) + b4_ref[...]

    # Numerically stable softmax over the (lane-dense, padded) feature axis.
    # Padded columns carry logits == -1e30 -> exp == 0, so the denominator is
    # exactly the sum over the real `unit` columns.
    m = jnp.max(logits, axis=-1, keepdims=True)
    e = jnp.exp(logits - m)
    denom = jnp.sum(e, axis=-1, keepdims=True)
    probs = e * pl.reciprocal(denom, approx=False)

    # Keep only the real output rows (plus <=7 sublane-pad rows, prob == 0),
    # transpose via XLU so the batch axis lands on the lane axis, store dense.
    unit_rows = o_ref.shape[0]
    o_ref[...] = jnp.transpose(probs[:, :unit_rows]).astype(o_ref.dtype)


def prepare_params(params, *, use_bf16=False):
    """One-time parameter prep (do NOT call per forward pass).

    - Pads layer 3 to 128 output lanes (zero cols) and layer 4's K dim to
      match (zero rows): bit-identical through ReLU, full-lane vregs.
    - Pads layer 4 to 128 output lanes with -1e30 bias in the padded columns
      so they vanish under exp() in the softmax.
    - Optionally casts weights (only) to bf16 for the MXU; biases stay f32.
      bf16 operands are a win on v5e/v6e/v7x; accumulation stays f32.
    """
    (w1, b1), (w2, b2), (w3, b3), (w4, b4) = params
    gene_size = w1.shape[0]
    unit = w4.shape[1]

    # Layer 3: 32 -> 128 output columns (zeros), bias zero-padded.
    h3_pad = _round_up(max(w3.shape[1], 128), 128)
    w3p = jnp.zeros((w3.shape[0], h3_pad), w3.dtype).at[:, :w3.shape[1]].set(w3)
    b3p = jnp.zeros((1, h3_pad), jnp.float32).at[:, :b3.shape[1]].set(b3)

    # Layer 4: K dim 32 -> 128 (zero rows), output unit -> 128 lanes.
    out_pad = _round_up(max(unit, 128), 128)
    w4p = jnp.zeros((h3_pad, out_pad), w4.dtype)
    w4p = w4p.at[:w4.shape[0], :unit].set(w4)
    b4p = jnp.full((1, out_pad), -1e30, jnp.float32).at[:, :unit].set(b4)

    wdt = jnp.bfloat16 if use_bf16 else w1.dtype
    weights = tuple(w.astype(wdt) for w in (w1, w2, w3p, w4p))
    biases = (b1.astype(jnp.float32), b2.astype(jnp.float32), b3p, b4p)
    return {
        "weights": weights,
        "biases": biases,
        "gene_size": gene_size,
        "unit": unit,
        "out_pad": out_pad,
    }


def _pick_batch_tile(B):
    # Tiny batches: one grid step (splitting <=512 rows across cores costs
    # more in ~0.35us/step overhead than it gains).
    if B <= 512:
        return _round_up(B, 8)
    # Otherwise target >=4 grid steps (megacore sharding on v7x, pipelined
    # DMA) with large MXU-friendly tiles, capped at 4096 rows so f32 tiles
    # stay comfortably inside v7x's smaller VMEM.
    return min(4096, _round_up(pl.cdiv(B, 4), 256))


def _full_spec(arr):
    nd = arr.ndim
    return pl.BlockSpec(arr.shape, lambda i, _nd=nd: (0,) * _nd)
    # NOTE: weights/biases are tiny (<1 MiB) and grid-invariant; single
    # buffering them (pipeline_mode=pl.Buffered(1)) would reclaim ~0.4 MiB of
    # VMEM but is skipped for lowering compatibility.


def d2_forward(x, prepared, *, batch_tile=None):
    """Forward pass. `prepared` comes from prepare_params() (done once)."""
    B, gene_size = x.shape
    w1, w2, w3, w4 = prepared["weights"]
    b1, b2, b3, b4 = prepared["biases"]
    unit = prepared["unit"]
    out_pad = prepared["out_pad"]
    assert gene_size == prepared["gene_size"]
    out_dtype = x.dtype
    unit_rows = _round_up(max(unit, 8), 8)  # sublane-aligned transposed rows

    # ---- batch tiling -------------------------------------------------------
    if batch_tile is None:
        batch_tile = _pick_batch_tile(B)
    batch_tile = max(8, min(_round_up(batch_tile, 8), _round_up(B, 8)))
    grid_n = pl.cdiv(B, batch_tile)
    if grid_n > 1 and batch_tile % 128 != 0:
        # transposed-output lane dim must be a multiple of 128 when tiled
        batch_tile = _round_up(batch_tile, 128)
        grid_n = pl.cdiv(B, batch_tile)
    B_pad = grid_n * batch_tile

    # Remainder rows: pad x with zeros (padded rows produce garbage-free,
    # well-defined probabilities that are sliced away below).
    if B_pad != B:
        x_in = jnp.zeros((B_pad, gene_size), x.dtype).at[:B, :].set(x)
    else:
        x_in = x

    # ---- VMEM budget (raise above v5e's 16 MiB default, cap for v7x) -------
    w_itemsize = w1.dtype.itemsize
    act_bytes = batch_tile * (
        4 * (gene_size + 512 + 128 + 128 + out_pad + unit_rows)   # f32 activations
        + w_itemsize * (gene_size + 512 + 128)                    # MXU-operand casts
        + 4 * (gene_size + unit_rows)                             # 2nd in/out buffers
    )
    w_bytes = 2 * (w_itemsize * (gene_size * 512 + 512 * 128 + 128 * 128 + 128 * out_pad)
                   + 4 * (512 + 128 + 128 + out_pad))
    vmem_limit = int(min(max((act_bytes + w_bytes) * 3 // 2, 32 * 1024 * 1024),
                         48 * 1024 * 1024))

    out_t = pl.pallas_call(
        d2_kernel,
        out_shape=jax.ShapeDtypeStruct((unit_rows, B_pad), out_dtype),
        grid_spec=pltpu.PrefetchScalarGridSpec(
            num_scalar_prefetch=0,
            grid=(grid_n,),
            in_specs=[
                pl.BlockSpec((batch_tile, gene_size), lambda i: (i, 0)),
                _full_spec(w1), _full_spec(b1),
                _full_spec(w2), _full_spec(b2),
                _full_spec(w3), _full_spec(b3),
                _full_spec(w4), _full_spec(b4),
            ],
            out_specs=pl.BlockSpec((unit_rows, batch_tile), lambda i: (0, i)),
        ),
        compiler_params=pltpu.CompilerParams(
            dimension_semantics=("parallel",),
            vmem_limit_bytes=vmem_limit,
        ),
    )(x_in, w1, b1, w2, b2, w3, b3, w4, b4)

    # Tiny (unit_rows x B_pad) slice+transpose back to the module's (B, unit)
    # layout — 16x less HBM traffic than slicing a 128-lane padded output.
    return jnp.transpose(out_t[:unit, :B])


def init_params(key, gene_size, unit):
    """Deterministic init mimicking nn.Linear default (uniform +-1/sqrt(fan_in))."""
    dims = [gene_size, 512, 128, 32, unit]
    params = []
    for fan_in, fan_out in zip(dims[:-1], dims[1:]):
        kw, kb, key = jax.random.split(key, 3)
        bound = 1.0 / jnp.sqrt(jnp.float32(fan_in))
        w = jax.random.uniform(kw, (fan_in, fan_out), jnp.float32, -bound, bound)
        # bias kept 2D (1, fan_out) so it broadcasts cleanly in-kernel
        b = jax.random.uniform(kb, (1, fan_out), jnp.float32, -bound, bound)
        params.append((w, b))
    return params


def d2_reference(x, params):
    h = x
    for i, (w, b) in enumerate(params):
        h = h @ w + b
        if i < len(params) - 1:
            h = jnp.maximum(h, 0.0)
    return jax.nn.softmax(h, axis=1)


if __name__ == "__main__":
    gene_size = 64
    unit = 8
    batch = 16

    key = jax.random.PRNGKey(0)
    kx, kp = jax.random.split(key)
    x = jax.random.normal(kx, (batch, gene_size), jnp.float32)
    params = init_params(kp, gene_size, unit)
    ref = d2_reference(x, params)

    # f32 path (single grid step at this tiny batch).
    prepped = prepare_params(params)
    out = jax.block_until_ready(d2_forward(x, prepped))
    assert out.shape == (batch, unit)
    assert jnp.allclose(out, ref, atol=1e-5, rtol=1e-5), "f32 mismatch vs reference"
    assert jnp.allclose(jnp.sum(out, axis=1), 1.0, atol=1e-5), "softmax rows must sum to 1"

    # bf16 MXU-operand path (recommended on v5e/v6e/v7x); looser tolerance.
    prepped_bf16 = prepare_params(params, use_bf16=True)
    out_bf16 = jax.block_until_ready(d2_forward(x, prepped_bf16))
    assert out_bf16.shape == (batch, unit)
    assert jnp.allclose(jnp.sum(out_bf16, axis=1), 1.0, atol=1e-3), "bf16 softmax rows must sum to 1"
    assert jnp.allclose(out_bf16, ref, atol=3e-2, rtol=3e-2), "bf16 path drifted too far"

    # Multi-step grid + non-divisible batch (padded remainder rows).
    batch2 = 300
    x2 = jax.random.normal(kx, (batch2, gene_size), jnp.float32)
    ref2 = d2_reference(x2, params)
    out2 = jax.block_until_ready(d2_forward(x2, prepped, batch_tile=128))
    assert out2.shape == (batch2, unit)
    assert jnp.allclose(out2, ref2, atol=1e-5, rtol=1e-5), "tiled/padded-batch mismatch"

    print("KERNEL_OK")
</pallas_src>

<mosaic_0001>
module attributes {stable_mosaic.version = 11 : i64} {
  func.func @d2_kernel(%arg0: i32, %arg1: memref<16x64xf32, #tpu.memory_space<vmem>>, %arg2: memref<64x512xf32, #tpu.memory_space<vmem>>, %arg3: memref<1x512xf32, #tpu.memory_space<vmem>>, %arg4: memref<512x128xf32, #tpu.memory_space<vmem>>, %arg5: memref<1x128xf32, #tpu.memory_space<vmem>>, %arg6: memref<128x128xf32, #tpu.memory_space<vmem>>, %arg7: memref<1x128xf32, #tpu.memory_space<vmem>>, %arg8: memref<128x128xf32, #tpu.memory_space<vmem>>, %arg9: memref<1x128xf32, #tpu.memory_space<vmem>>, %arg10: memref<8x16xf32, #tpu.memory_space<vmem>>) attributes {dimension_semantics = [#tpu.dimension_semantics<parallel>], iteration_bounds = array<i64: 1>, scalar_prefetch = 0 : i64, scratch_operands = 0 : i64, tpu.core_type = #tpu.core_type<tc>, window_params = [{transform_indices = @transform_0, window_bounds = array<i64: 16, 64>}, {pipeline_mode = #tpu.pipeline_mode<synchronous>, transform_indices = @transform_1, window_bounds = array<i64: 64, 512>}, {pipeline_mode = #tpu.pipeline_mode<synchronous>, transform_indices = @transform_2, window_bounds = array<i64: 1, 512>}, {pipeline_mode = #tpu.pipeline_mode<synchronous>, transform_indices = @transform_3, window_bounds = array<i64: 512, 128>}, {pipeline_mode = #tpu.pipeline_mode<synchronous>, transform_indices = @transform_4, window_bounds = array<i64: 1, 128>}, {pipeline_mode = #tpu.pipeline_mode<synchronous>, transform_indices = @transform_5, window_bounds = array<i64: 128, 128>}, {pipeline_mode = #tpu.pipeline_mode<synchronous>, transform_indices = @transform_6, window_bounds = array<i64: 1, 128>}, {pipeline_mode = #tpu.pipeline_mode<synchronous>, transform_indices = @transform_7, window_bounds = array<i64: 128, 128>}, {pipeline_mode = #tpu.pipeline_mode<synchronous>, transform_indices = @transform_8, window_bounds = array<i64: 1, 128>}, {transform_indices = @transform_9, window_bounds = array<i64: 8, 16>}]} {
    %c0 = arith.constant 0 : index
    %c0_0 = arith.constant 0 : index
    %0 = vector.load %arg1[%c0, %c0_0] : memref<16x64xf32, #tpu.memory_space<vmem>>, vector<16x64xf32>
    %c0_1 = arith.constant 0 : index
    %c0_2 = arith.constant 0 : index
    %1 = vector.load %arg2[%c0_1, %c0_2] : memref<64x512xf32, #tpu.memory_space<vmem>>, vector<64x512xf32>
    %cst = arith.constant dense<0.000000e+00> : vector<16x512xf32>
    %2 = tpu.matmul %0, %1, %cst {dimension_numbers = #tpu.dot_dimension_numbers<[1], [0], [0], [1], [0, 0, 1, 1], [], []>} : vector<16x64xf32>, vector<64x512xf32>, vector<16x512xf32> -> vector<16x512xf32>
    %c0_3 = arith.constant 0 : index
    %c0_4 = arith.constant 0 : index
    %3 = vector.load %arg3[%c0_3, %c0_4] : memref<1x512xf32, #tpu.memory_space<vmem>>, vector<1x512xf32>
    %4 = vector.broadcast %3 : vector<1x512xf32> to vector<16x512xf32>
    %5 = arith.addf %2, %4 : vector<16x512xf32>
    %cst_5 = arith.constant 0.000000e+00 : f32
    %6 = vector.broadcast %cst_5 : f32 to vector<16x512xf32>
    %7 = arith.maximumf %5, %6 : vector<16x512xf32>
    %c0_6 = arith.constant 0 : index
    %c0_7 = arith.constant 0 : index
    %8 = vector.load %arg4[%c0_6, %c0_7] : memref<512x128xf32, #tpu.memory_space<vmem>>, vector<512x128xf32>
    %cst_8 = arith.constant dense<0.000000e+00> : vector<16x128xf32>
    %9 = tpu.matmul %7, %8, %cst_8 {dimension_numbers = #tpu.dot_dimension_numbers<[1], [0], [0], [1], [0, 0, 1, 1], [], []>} : vector<16x512xf32>, vector<512x128xf32>, vector<16x128xf32> -> vector<16x128xf32>
    %c0_9 = arith.constant 0 : index
    %c0_10 = arith.constant 0 : index
    %10 = vector.load %arg5[%c0_9, %c0_10] : memref<1x128xf32, #tpu.memory_space<vmem>>, vector<1x128xf32>
    %11 = vector.broadcast %10 : vector<1x128xf32> to vector<16x128xf32>
    %12 = arith.addf %9, %11 : vector<16x128xf32>
    %cst_11 = arith.constant 0.000000e+00 : f32
    %13 = vector.broadcast %cst_11 : f32 to vector<16x128xf32>
    %14 = arith.maximumf %12, %13 : vector<16x128xf32>
    %c0_12 = arith.constant 0 : index
    %c0_13 = arith.constant 0 : index
    %15 = vector.load %arg6[%c0_12, %c0_13] : memref<128x128xf32, #tpu.memory_space<vmem>>, vector<128x128xf32>
    %cst_14 = arith.constant dense<0.000000e+00> : vector<16x128xf32>
    %16 = tpu.matmul %14, %15, %cst_14 {dimension_numbers = #tpu.dot_dimension_numbers<[1], [0], [0], [1], [0, 0, 1, 1], [], []>} : vector<16x128xf32>, vector<128x128xf32>, vector<16x128xf32> -> vector<16x128xf32>
    %c0_15 = arith.constant 0 : index
    %c0_16 = arith.constant 0 : index
    %17 = vector.load %arg7[%c0_15, %c0_16] : memref<1x128xf32, #tpu.memory_space<vmem>>, vector<1x128xf32>
    %18 = vector.broadcast %17 : vector<1x128xf32> to vector<16x128xf32>
    %19 = arith.addf %16, %18 : vector<16x128xf32>
    %cst_17 = arith.constant 0.000000e+00 : f32
    %20 = vector.broadcast %cst_17 : f32 to vector<16x128xf32>
    %21 = arith.maximumf %19, %20 : vector<16x128xf32>
    %c0_18 = arith.constant 0 : index
    %c0_19 = arith.constant 0 : index
    %22 = vector.load %arg8[%c0_18, %c0_19] : memref<128x128xf32, #tpu.memory_space<vmem>>, vector<128x128xf32>
    %cst_20 = arith.constant dense<0.000000e+00> : vector<16x128xf32>
    %23 = tpu.matmul %21, %22, %cst_20 {dimension_numbers = #tpu.dot_dimension_numbers<[1], [0], [0], [1], [0, 0, 1, 1], [], []>} : vector<16x128xf32>, vector<128x128xf32>, vector<16x128xf32> -> vector<16x128xf32>
    %c0_21 = arith.constant 0 : index
    %c0_22 = arith.constant 0 : index
    %24 = vector.load %arg9[%c0_21, %c0_22] : memref<1x128xf32, #tpu.memory_space<vmem>>, vector<1x128xf32>
    %25 = vector.broadcast %24 : vector<1x128xf32> to vector<16x128xf32>
    %26 = arith.addf %23, %25 : vector<16x128xf32>
    %cst_23 = arith.constant dense<0xFF800000> : vector<16xf32>
    %27 = vector.multi_reduction <maximumf>, %26, %cst_23 [1] : vector<16x128xf32> to vector<16xf32>
    %28 = vector.shape_cast %27 : vector<16xf32> to vector<16x1xf32>
    %29 = vector.broadcast %28 : vector<16x1xf32> to vector<16x128xf32>
    %30 = arith.subf %26, %29 : vector<16x128xf32>
    %31 = math.exp %30 : vector<16x128xf32>
    %cst_24 = arith.constant dense<0.000000e+00> : vector<16xf32>
    %32 = vector.multi_reduction <add>, %31, %cst_24 [1] : vector<16x128xf32> to vector<16xf32>
    %33 = vector.shape_cast %32 : vector<16xf32> to vector<16x1xf32>
    %34 = tpu.reciprocal %33 : vector<16x1xf32> -> vector<16x1xf32>
    %35 = vector.broadcast %34 : vector<16x1xf32> to vector<16x128xf32>
    %36 = arith.mulf %31, %35 : vector<16x128xf32>
    %37 = vector.extract_strided_slice %36 {offsets = [0, 0], sizes = [16, 8], strides = [1, 1]} : vector<16x128xf32> to vector<16x8xf32>
    %38 = tpu.transpose %37, [1, 0] : vector<16x8xf32> -> vector<8x16xf32>
    %c0_25 = arith.constant 0 : index
    %c0_26 = arith.constant 0 : index
    %39 = vector.load %arg10[%c0_25, %c0_26] : memref<8x16xf32, #tpu.memory_space<vmem>>, vector<8x16xf32>
    tpu.vector_store %arg10[%c0_25, %c0_26], %38 {strides = array<i32>} : memref<8x16xf32, #tpu.memory_space<vmem>>, vector<8x16xf32>,
    return
  }
  func.func @transform_0(%arg0: i32) -> (i32, i32) {
    %c0_i32 = arith.constant 0 : i32
    %c0_i32_0 = arith.constant 0 : i32
    return %arg0, %c0_i32 : i32, i32
  }
  func.func @transform_1(%arg0: i32) -> (i32, i32) {
    %c0_i32 = arith.constant 0 : i32
    %c0_i32_0 = arith.constant 0 : i32
    %c0_i32_1 = arith.constant 0 : i32
    return %c0_i32, %c0_i32_0 : i32, i32
  }
  func.func @transform_2(%arg0: i32) -> (i32, i32) {
    %c0_i32 = arith.constant 0 : i32
    %c0_i32_0 = arith.constant 0 : i32
    %c0_i32_1 = arith.constant 0 : i32
    return %c0_i32, %c0_i32_0 : i32, i32
  }
  func.func @transform_3(%arg0: i32) -> (i32, i32) {
    %c0_i32 = arith.constant 0 : i32
    %c0_i32_0 = arith.constant 0 : i32
    %c0_i32_1 = arith.constant 0 : i32
    return %c0_i32, %c0_i32_0 : i32, i32
  }
  func.func @transform_4(%arg0: i32) -> (i32, i32) {
    %c0_i32 = arith.constant 0 : i32
    %c0_i32_0 = arith.constant 0 : i32
    %c0_i32_1 = arith.constant 0 : i32
    return %c0_i32, %c0_i32_0 : i32, i32
  }
  func.func @transform_5(%arg0: i32) -> (i32, i32) {
    %c0_i32 = arith.constant 0 : i32
    %c0_i32_0 = arith.constant 0 : i32
    %c0_i32_1 = arith.constant 0 : i32
    return %c0_i32, %c0_i32_0 : i32, i32
  }
  func.func @transform_6(%arg0: i32) -> (i32, i32) {
    %c0_i32 = arith.constant 0 : i32
    %c0_i32_0 = arith.constant 0 : i32
    %c0_i32_1 = arith.constant 0 : i32
    return %c0_i32, %c0_i32_0 : i32, i32
  }
  func.func @transform_7(%arg0: i32) -> (i32, i32) {
    %c0_i32 = arith.constant 0 : i32
    %c0_i32_0 = arith.constant 0 : i32
    %c0_i32_1 = arith.constant 0 : i32
    return %c0_i32, %c0_i32_0 : i32, i32
  }
  func.func @transform_8(%arg0: i32) -> (i32, i32) {
    %c0_i32 = arith.constant 0 : i32
    %c0_i32_0 = arith.constant 0 : i32
    %c0_i32_1 = arith.constant 0 : i32
    return %c0_i32, %c0_i32_0 : i32, i32
  }
  func.func @transform_9(%arg0: i32) -> (i32, i32) {
    %c0_i32 = arith.constant 0 : i32
    %c0_i32_0 = arith.constant 0 : i32
    return %c0_i32, %arg0 : i32, i32
  }
}

</mosaic_0001>

<bundles_post_ra>
// kernel: tpu_custom_call.1
= control target key start
LH: loop header
LB: loop body
LE: loop exit
PB: predicated region body
PF: predicated region fallthrough
CT: control target
= control target key end

     0   :  { %14 = vsyncpa [#allocation3], 0  ;;  %s1489_s0 = inlined_call_operand.hbm [shape: f32[16,64], index: 0, kind: input, shape index: {}]   ;;  %s1490_s1 = inlined_call_operand.hbm [shape: f32[64,512], index: 1, kind: input, shape index: {}]   ;;  %s1491_s2 = inlined_call_operand.vmem [shape: f32[1,512], index: 2, kind: input, shape index: {}]   ;;  %s1492_s3 = inlined_call_operand.hbm [shape: f32[512,128], index: 3, kind: input, shape index: {}]   ;;  %s1493_s4 = inlined_call_operand.vmem [shape: f32[1,128], index: 4, kind: input, shape index: {}]   ;;  %s1494_s5 = inlined_call_operand.hbm [shape: f32[128,128], index: 5, kind: input, shape index: {}]   ;;  %s1495_s6 = inlined_call_operand.vmem [shape: f32[1,128], index: 6, kind: input, shape index: {}]   ;;  %s1496_s7 = inlined_call_operand.hbm [shape: f32[128,128], index: 7, kind: input, shape index: {}]   ;;  %s1497_s8 = inlined_call_operand.vmem [shape: f32[1,128], index: 8, kind: input, shape index: {}]   ;;  %s1498_s9 = inlined_call_operand.hbm [shape: f32[8,16], index: 9, kind: output, shape index: {}]  }
   0x1   :  { %15 = vsyncpa [#allocation6], 0 }
   0x2   :  { %16 = vsyncpa [#allocation9], 0 }
   0x3   :  { %17 = vsyncpa [#allocation4], 0  ;;  %s1324_s30 = smov [#allocation5]   ;;  %s1184_s13 = scalar_lea.hbm %s1490_s1, 4096 }
   0x4   :  { %s35_s10 = sshll.u32 %s1324_s30, 4  ;;  %p1185_p0 = scmp.ne.s32.totalorder %s1490_s1, %s1184_s13  ;;  %s36_s10 = int_to_ptr.vmem [resolvable:$true] %s35_s10 }
   0x5   :  { %p1188_p1 = scmp.lt.u32.totalorder %s1184_s13, %s1490_s1 }
   0x7   :  { %p1190_p2 = pnand %p1188_p1, %p1185_p0 }
   0x9   :  { %1193 = shalt.err (!%p1190_p2)
}
   0xa   :  { %s1194_s18 = scalar_lea.vmem %s36_s10, 4096  ;;  %p1199_p4 = scmp.lt.s32.totalorder %s36_s10, %s36_s10 }
   0xb   :  { %p1195_p3 = scmp.ne.s32.totalorder %s36_s10, %s1194_s18  ;;  %p1200_p5 = scmp.lt.s32.totalorder %s1194_s18, %s1194_s18 }
   0xd   :  { %p1201_p6 = por %p1200_p5, %p1199_p4 }
   0xf   :  { %p1202_p7 = pnand %p1201_p6, %p1195_p3 }
  0x11   :  { %1205 = shalt.err (!%p1202_p7)
}
  0x12   :  { %s1325_s19 = smov 512   ;;  %s1326_s20 = smov 32  }
  0x13   :  { %41 = dma.hbm_to_vmem [thread:$0]  %s1490_s1, 4096, %s36_s10, [#allocation6], %s1325_s19, %s1325_s19, %s1326_s20  }
  0x14   :  { %s1327_s23 = smov [#allocation8]   ;;  %s1328_s25 = smov [#allocation2]  }
  0x15   :  { %s63_s24 = sshll.u32 %s1327_s23, 4  ;;  %s23_s26 = sshll.u32 %s1328_s25, 4  ;;  %s64_s24 = int_to_ptr.vmem [resolvable:$true] %s63_s24  ;;  %s24_s26 = int_to_ptr.vmem [resolvable:$true] %s23_s26 }
  0x16   :  { %s1206_s29 = scalar_lea.hbm %s1494_s5, 2048 }
  0x17   :  { %p1207_p8 = scmp.ne.s32.totalorder %s1494_s5, %s1206_s29  ;;  %p1210_p9 = scmp.lt.u32.totalorder %s1206_s29, %s1494_s5 }
  0x19   :  { %p1212_p10 = pnand %p1210_p9, %p1207_p8 }
  0x1b   :  { %1215 = shalt.err (!%p1212_p10)
}
  0x1c   :  { %s1216_s1 = scalar_lea.vmem %s64_s24, 2048  ;;  %p1221_p12 = scmp.lt.s32.totalorder %s64_s24, %s64_s24 }
  0x1d   :  { %p1217_p11 = scmp.ne.s32.totalorder %s64_s24, %s1216_s1  ;;  %p1222_p13 = scmp.lt.s32.totalorder %s1216_s1, %s1216_s1 }
  0x1f   :  { %p1223_p0 = por %p1222_p13, %p1221_p12 }
  0x21   :  { %p1224_p1 = pnand %p1223_p0, %p1217_p11 }
  0x23   :  { %1227 = shalt.err (!%p1224_p1)
}
  0x24   :  { %s1329_s10 = smov 128   ;;  %s1330_s14 = smov 8  }
  0x25   :  { %69 = dma.hbm_to_vmem [thread:$0]  %s1494_s5, 2048, %s64_s24, [#allocation9], %s1329_s10, %s1329_s10, %s1330_s14  }
  0x26   :  { %s1228_s19 = scalar_lea.hbm %s1489_s0, 256 }
  0x27   :  { %p1229_p2 = scmp.ne.s32.totalorder %s1489_s0, %s1228_s19  ;;  %p1232_p3 = scmp.lt.u32.totalorder %s1228_s19, %s1489_s0 }
  0x29   :  { %p1234_p4 = pnand %p1232_p3, %p1229_p2 }
  0x2b   :  { %1237 = shalt.err (!%p1234_p4)
}
  0x2c   :  { %s1238_s25 = scalar_lea.vmem %s24_s26, 256  ;;  %p1243_p6 = scmp.lt.s32.totalorder %s24_s26, %s24_s26 }
  0x2d   :  { %p1239_p5 = scmp.ne.s32.totalorder %s24_s26, %s1238_s25  ;;  %p1244_p7 = scmp.lt.s32.totalorder %s1238_s25, %s1238_s25 }
  0x2f   :  { %p1245_p8 = por %p1244_p7, %p1243_p6 }
  0x31   :  { %p1246_p9 = pnand %p1245_p8, %p1239_p5 }
  0x33   :  { %1249 = shalt.err (!%p1246_p9)
}
  0x34   :  { %29 = dma.hbm_to_vmem [thread:$0]  %s1489_s0, 256, %s24_s26, [#allocation3], %s1329_s10, %s1329_s10, %s1330_s14  }
  0x35   :  { %s1331_s27 = smov [#allocation7]   ;;  %s1332_s29 = smov [#allocation10]  }
  0x36   :  { %s49_s28 = sshll.u32 %s1331_s27, 4  ;;  %s77_s30 = sshll.u32 %s1332_s29, 4  ;;  %s50_s28 = int_to_ptr.vmem [resolvable:$true] %s49_s28  ;;  %s78_s30 = int_to_ptr.vmem [resolvable:$true] %s77_s30 }
  0x37   :  { %s1250_s13 = scalar_lea.hbm %s1492_s3, 8192 }
  0x38   :  { %p1251_p10 = scmp.ne.s32.totalorder %s1492_s3, %s1250_s13  ;;  %p1254_p11 = scmp.lt.u32.totalorder %s1250_s13, %s1492_s3 }
  0x3a   :  { %p1256_p12 = pnand %p1254_p11, %p1251_p10 }
  0x3c   :  { %1259 = shalt.err (!%p1256_p12)
}
  0x3d   :  { %s1260_s0 = scalar_lea.vmem %s50_s28, 8192  ;;  %p1265_p0 = scmp.lt.s32.totalorder %s50_s28, %s50_s28 }
  0x3e   :  { %p1261_p13 = scmp.ne.s32.totalorder %s50_s28, %s1260_s0  ;;  %p1266_p1 = scmp.lt.s32.totalorder %s1260_s0, %s1260_s0 }
  0x40   :  { %p1267_p2 = por %p1266_p1, %p1265_p0 }
  0x42   :  { %p1268_p3 = pnand %p1267_p2, %p1261_p13 }
  0x44   :  { %1271 = shalt.err (!%p1268_p3)
}
  0x45   :  { %55 = dma.hbm_to_vmem [thread:$0]  %s1492_s3, 8192, %s50_s28, [#allocation6], %s1329_s10, %s1329_s10, %s1330_s14  }
  0x46   :  { %s1272_s21 = scalar_lea.hbm %s1496_s7, 2048 }
  0x47   :  { %p1273_p4 = scmp.ne.s32.totalorder %s1496_s7, %s1272_s21  ;;  %p1276_p5 = scmp.lt.u32.totalorder %s1272_s21, %s1496_s7 }
  0x49   :  { %p1278_p6 = pnand %p1276_p5, %p1273_p4 }
  0x4b   :  { %1281 = shalt.err (!%p1278_p6)
}
  0x4c   :  { %s1282_s24 = scalar_lea.vmem %s78_s30, 2048  ;;  %p1287_p8 = scmp.lt.s32.totalorder %s78_s30, %s78_s30 }
  0x4d   :  { %p1283_p7 = scmp.ne.s32.totalorder %s78_s30, %s1282_s24  ;;  %p1288_p9 = scmp.lt.s32.totalorder %s1282_s24, %s1282_s24 }
  0x4f   :  { %p1289_p10 = por %p1288_p9, %p1287_p8 }
  0x51   :  { %p1290_p11 = pnand %p1289_p10, %p1283_p7 }
  0x53   :  { %1293 = shalt.err (!%p1290_p11)
}
  0x54   :  { %83 = dma.hbm_to_vmem [thread:$0]  %s1496_s7, 2048, %s78_s30, [#allocation9], %s1329_s10, %s1329_s10, %s1330_s14  }
  0x55   :  { %1316 = dma.done.wait [#allocation3], 256  }
  0x56   :  { %1317 = vsyncadd [#allocation3], 4294967040 }
  0x57   :  { %1318 = dma.done.wait [#allocation6], 12288  }
  0x58   :  { %1319 = vsyncadd [#allocation6], 4294955008 }
  0x59   :  { %1320 = dma.done.wait [#allocation9], 4096  }
  0x5a   :  { %1321 = vsyncadd [#allocation9], 4294963200  ;;  %v1333_v0 = vmov 0.0   ;;  %v104_v1 = vld [vmem:[#allocation5 + $0x8] sm:$0xff]  ;;  %v106_v3 = vld [vmem:[#allocation5 + $0x18] sm:$0xff]  ;;  %vm157_vm0 = vcmask 523264  }
  0x5b   :  { %228 = vmatprep.mubr.f32.mxu0 %v1333_v0  ;;  %305 = vmatprep.mubr.f32.mxu1 %v1333_v0  ;;  %v108_v2 = vld [vmem:[#allocation5 + $0x28] sm:$0xff]  ;;  %v110_v5 = vld [vmem:[#allocation5 + $0x38] sm:$0xff]  ;;  %v103_v6 = vld [vmem:[#allocation5] sm:$0xff]  ;;  %vm797_vm1 = vcmask 130048  }
  0x5c   :  { %v1005_v4 = vpack.c.bf16 %v108_v2, %v104_v1  ;;  %v107_v7 = vld [vmem:[#allocation5 + $0x20] sm:$0xff]  ;;  %v1021_v8 = vpack.c.bf16 %v110_v5, %v106_v3  ;;  %v105_v10 = vld [vmem:[#allocation5 + $0x10] sm:$0xff]  ;;  %v112_v12 = vld [vmem:[#allocation5 + $0x48] sm:$0xff] }
  0x5d   :  { %v1007_v9 = vpack.c.bf16 %v107_v7, %v103_v6  ;;  %v109_v11 = vld [vmem:[#allocation5 + $0x30] sm:$0xff]  ;;  %v116_v14 = vld [vmem:[#allocation5 + $0x68] sm:$0xff]  ;;  %v114_v15 = vld [vmem:[#allocation5 + $0x58] sm:$0xff] }
  0x5e   :  { %1006 = vmatprep.subr.bf16.mxu0 %v1005_v4  ;;  %v1023_v13 = vpack.c.bf16 %v109_v11, %v105_v10  ;;  %v118_v16 = vld [vmem:[#allocation5 + $0x78] sm:$0xff]  ;;  %1022 = vmatprep.subr.bf16.mxu1 %v1021_v8  ;;  %v1009_v17 = vpack.c.bf16 %v116_v14, %v112_v12  ;;  %v111_v19 = vld [vmem:[#allocation5 + $0x40] sm:$0xff]  ;;  %v113_v21 = vld [vmem:[#allocation5 + $0x50] sm:$0xff] }
  0x5f   :  { %1008 = vmatpush1.bf16.msra.mxu0 %v1007_v9  ;;  %v1025_v18 = vpack.c.bf16 %v118_v16, %v114_v15  ;;  %v115_v20 = vld [vmem:[#allocation5 + $0x60] sm:$0xff]  ;;  %v117_v23 = vld [vmem:[#allocation5 + $0x70] sm:$0xff]  ;;  %v120_v24 = vld [vmem:[#allocation5 + $0x88] sm:$0xff] }
  0x60   :  { %1024 = vmatpush1.bf16.msra.mxu1 %v1023_v13  ;;  %v1011_v22 = vpack.c.bf16 %v115_v20, %v111_v19  ;;  %v124_v25 = vld [vmem:[#allocation5 + $0xa8] sm:$0xff]  ;;  %1010 = vmatprep.subr.bf16.mxu0 %v1009_v17  ;;  %v1027_v26 = vpack.c.bf16 %v117_v23, %v113_v21  ;;  %v122_v28 = vld [vmem:[#allocation5 + $0x98] sm:$0xff]  ;;  %v119_v30 = vld [vmem:[#allocation5 + $0x80] sm:$0xff] }
  0x61   :  { %1026 = vmatprep.subr.bf16.mxu1 %v1025_v18  ;;  %v1013_v27 = vpack.c.bf16 %v124_v25, %v120_v24  ;;  %v126_v29 = vld [vmem:[#allocation5 + $0xb8] sm:$0xff]  ;;  %v123_v32 = vld [vmem:[#allocation5 + $0xa0] sm:$0xff]  ;;  %v121_v33 = vld [vmem:[#allocation5 + $0x90] sm:$0xff] }
  0x62   :  { %v1029_v31 = vpack.c.bf16 %v126_v29, %v122_v28  ;;  %v125_v34 = vld [vmem:[#allocation5 + $0xb0] sm:$0xff]  ;;  %v1015_v35 = vpack.c.bf16 %v123_v32, %v119_v30  ;;  %v128_v36 = vld [vmem:[#allocation5 + $0xc8] sm:$0xff]  ;;  %v130_v38 = vld [vmem:[#allocation5 + $0xd8] sm:$0xff] }
  0x63   :  { %1012 = vmatpush1.bf16.msra.mxu0 %v1011_v22  ;;  %v132_v37 = vld [vmem:[#allocation5 + $0xe8] sm:$0xff]  ;;  %v1031_v39 = vpack.c.bf16 %v125_v34, %v121_v33  ;;  %v134_v41 = vld [vmem:[#allocation5 + $0xf8] sm:$0xff]  ;;  %v127_v42 = vld [vmem:[#allocation5 + $0xc0] sm:$0xff] }
  0x64   :  { %1028 = vmatpush1.bf16.msra.mxu1 %v1027_v26  ;;  %1014 = vmatprep.subr.bf16.mxu0 %v1013_v27  ;;  %v1017_v40 = vpack.c.bf16 %v132_v37, %v128_v36  ;;  %v131_v43 = vld [vmem:[#allocation5 + $0xe0] sm:$0xff]  ;;  %v1033_v44 = vpack.c.bf16 %v134_v41, %v130_v38  ;;  %v129_v45 = vld [vmem:[#allocation5 + $0xd0] sm:$0xff]  ;;  %v343_v48 = vld [vmem:[#allocation7 + $0x88] sm:$0xff] }
  0x65   :  { %1030 = vmatprep.subr.bf16.mxu1 %v1029_v31  ;;  %v133_v46 = vld [vmem:[#allocation5 + $0xf0] sm:$0xff]  ;;  %v342_v47 = vld [vmem:[#allocation7 + $0x80] sm:$0xff]  ;;  %v1019_v49 = vpack.c.bf16 %v131_v43, %v127_v42  ;;  %v375_v51 = vld [vmem:[#allocation7 + $0x188] sm:$0xff] }
  0x66   :  { %v374_v50 = vld [vmem:[#allocation7 + $0x180] sm:$0xff]  ;;  %v1035_v52 = vpack.c.bf16 %v133_v46, %v129_v45  ;;  %v1037_v53 = vpack.c.bf16 %v343_v48, %v342_v47  ;;  %v327_v56 = vld [vmem:[#allocation7 + $0x8] sm:$0xff]  ;;  %v344_v59 = vld [vmem:[#allocation7 + $0x90] sm:$0xff] }
  0x67   :  { %1016 = vmatpush1.bf16.msra.mxu0 %v1015_v35  ;;  %v1069_v54 = vpack.c.bf16 %v375_v51, %v374_v50  ;;  %v326_v55 = vld [vmem:[#allocation7] sm:$0xff]  ;;  %v359_v58 = vld [vmem:[#allocation7 + $0x108] sm:$0xff]  ;;  %v345_v60 = vld [vmem:[#allocation7 + $0x98] sm:$0xff] }
  0x68   :  { %1032 = vmatpush1.bf16.msra.mxu1 %v1031_v39  ;;  %1018 = vmatprep.subr.bf16.mxu0 %v1017_v40  ;;  %v358_v57 = vld [vmem:[#allocation7 + $0x100] sm:$0xff]  ;;  %v101_v61 = vld [vmem:[#allocation2] sm:$0xff]  ;;  %v377_v63 = vld [vmem:[#allocation7 + $0x198] sm:$0xff]  ;;  %v1039_v1 = vpack.c.bf16 %v327_v56, %v326_v55  ;;  %v1041_v3 = vpack.c.bf16 %v345_v60, %v344_v59 }
  0x69   :  { %1034 = vmatprep.subr.bf16.mxu1 %v1033_v44  ;;  %v376_v62 = vld [vmem:[#allocation7 + $0x190] sm:$0xff]  ;;  %v1071_v2 = vpack.c.bf16 %v359_v58, %v358_v57  ;;  %v329_v5 = vld [vmem:[#allocation7 + $0x18] sm:$0xff]  ;;  %v346_v9 = vld [vmem:[#allocation7 + $0xa0] sm:$0xff] }
  0x6a   :  { %v328_v4 = vld [vmem:[#allocation7 + $0x10] sm:$0xff]  ;;  %v1073_v7 = vpack.c.bf16 %v377_v63, %v376_v62  ;;  %v361_v8 = vld [vmem:[#allocation7 + $0x118] sm:$0xff]  ;;  %v347_v10 = vld [vmem:[#allocation7 + $0xa8] sm:$0xff] }
  0x6b   :  { %1020 = vmatpush1.bf16.msra.mxu0 %v1019_v49  ;;  %v360_v6 = vld [vmem:[#allocation7 + $0x110] sm:$0xff]  ;;  %v102_v11 = vld [vmem:[#allocation2 + $0x8] sm:$0xff]  ;;  %v378_v12 = vld [vmem:[#allocation7 + $0x1a0] sm:$0xff]  ;;  %v1043_v14 = vpack.c.bf16 %v329_v5, %v328_v4  ;;  %v1045_v16 = vpack.c.bf16 %v347_v10, %v346_v9 }
  0x6c   :  { %1036 = vmatpush1.bf16.msra.mxu1 %v1035_v52  ;;  %1038 = vmatprep.subr.bf16.mxu0 %v1037_v53  ;;  %v379_v13 = vld [vmem:[#allocation7 + $0x1a8] sm:$0xff]  ;;  %v1075_v15 = vpack.c.bf16 %v361_v8, %v360_v6  ;;  %v330_v17 = vld [vmem:[#allocation7 + $0x20] sm:$0xff]  ;;  %v348_v22 = vld [vmem:[#allocation7 + $0xb0] sm:$0xff] }
  0x6d   :  { %1070 = vmatprep.subr.bf16.mxu1 %v1069_v54  ;;  %v331_v18 = vld [vmem:[#allocation7 + $0x28] sm:$0xff]  ;;  %v362_v19 = vld [vmem:[#allocation7 + $0x120] sm:$0xff]  ;;  %v1077_v20 = vpack.c.bf16 %v379_v13, %v378_v12  ;;  %v349_v23 = vld [vmem:[#allocation7 + $0xb8] sm:$0xff] }
  0x6e   :  { %816 = vmatmul.mubr.msk.f32.vlgmr.msra.gmra.mrb[0].mxu0 %vm157_vm0, %v101_v61  ;;  %v363_v21 = vld [vmem:[#allocation7 + $0x128] sm:$0xff]  ;;  %v380_v24 = vld [vmem:[#allocation7 + $0x1b0] sm:$0xff]  ;;  %v1047_v25 = vpack.c.bf16 %v331_v18, %v330_v17  ;;  %v1049_v27 = vpack.c.bf16 %v349_v23, %v348_v22  ;;  %v333_v29 = vld [vmem:[#allocation7 + $0x38] sm:$0xff]  ;;  %v137_v23 = vlaneseq }
  0x6f   :  { %818 = vmatmul.mubr.msk.f32.vlgmr.msra.gmra.mrb[0].mxu1 %vm157_vm0, %v101_v61  ;;  %234 = vmatprep.mubr.f32.mxu0 %v1333_v0  ;;  %v1079_v26 = vpack.c.bf16 %v363_v21, %v362_v19  ;;  %v332_v28 = vld [vmem:[#allocation7 + $0x30] sm:$0xff]  ;;  %v365_v32 = vld [vmem:[#allocation7 + $0x138] sm:$0xff]  ;;  %v350_v33 = vld [vmem:[#allocation7 + $0xc0] sm:$0xff] }
  0x70   :  { %311 = vmatprep.mubr.f32.mxu1 %v1333_v0  ;;  %1040 = vmatpush3.bf16.msra.mxu0 %v1039_v1  ;;  %v381_v0 = vld [vmem:[#allocation7 + $0x1b8] sm:$0xff]  ;;  %v364_v30 = vld [vmem:[#allocation7 + $0x130] sm:$0xff]  ;;  %v351_v34 = vld [vmem:[#allocation7 + $0xc8] sm:$0xff]  ;;  %v1051_v37 = vpack.c.bf16 %v333_v29, %v332_v28 }
  0x71   :  { %1072 = vmatpush3.bf16.msra.mxu1 %v1071_v2  ;;  %1042 = vmatprep.subr.bf16.mxu0 %v1041_v3  ;;  %v1081_v31 = vpack.c.bf16 %v381_v0, %v380_v24  ;;  %v382_v35 = vld [vmem:[#allocation7 + $0x1c0] sm:$0xff]  ;;  %v383_v36 = vld [vmem:[#allocation7 + $0x1c8] sm:$0xff]  ;;  %v1083_v38 = vpack.c.bf16 %v365_v32, %v364_v30  ;;  %v1053_v39 = vpack.c.bf16 %v351_v34, %v350_v33  ;;  %v352_v45 = vld [vmem:[#allocation7 + $0xd0] sm:$0xff]  ;;  %v138_v24 = vshrl.u32 %v137_v23, 7 }
  0x72   :  { %817 = vmatmul.mubr.msk.f32.gmra.mrb[2].mxu0 %vm157_vm0, %v102_v11  ;;  %1074 = vmatprep.subr.bf16.mxu1 %v1073_v7  ;;  %v334_v40 = vld [vmem:[#allocation7 + $0x40] sm:$0xff]  ;;  %v335_v41 = vld [vmem:[#allocation7 + $0x48] sm:$0xff]  ;;  %v1085_v43 = vpack.c.bf16 %v383_v36, %v382_v35  ;;  %v353_v46 = vld [vmem:[#allocation7 + $0xd8] sm:$0xff] }
  0x73   :  { %819 = vmatmul.mubr.msk.f32.gmra.mrb[2].mxu1 %vm157_vm0, %v102_v11  ;;  %v366_v42 = vld [vmem:[#allocation7 + $0x140] sm:$0xff]  ;;  %v367_v44 = vld [vmem:[#allocation7 + $0x148] sm:$0xff]  ;;  %v384_v47 = vld [vmem:[#allocation7 + $0x1d0] sm:$0xff]  ;;  %v1055_v49 = vpack.c.bf16 %v335_v41, %v334_v40  ;;  %v1057_v51 = vpack.c.bf16 %v353_v46, %v352_v45  ;;  %v139_v0 = vsub.s32 0, %v138_v24  ;;  %v151_v28 = vsub.s32 3, %v138_v24 }
  0x74   :  { %1044 = vmatpush3.bf16.msra.mxu0 %v1043_v14  ;;  %v385_v48 = vld [vmem:[#allocation7 + $0x1d8] sm:$0xff]  ;;  %v1087_v50 = vpack.c.bf16 %v367_v44, %v366_v42  ;;  %v336_v52 = vld [vmem:[#allocation7 + $0x50] sm:$0xff]  ;;  %v354_v57 = vld [vmem:[#allocation7 + $0xe0] sm:$0xff] }
  0x75   :  { %1076 = vmatpush3.bf16.msra.mxu1 %v1075_v15  ;;  %1046 = vmatprep.subr.bf16.mxu0 %v1045_v16  ;;  %v337_v53 = vld [vmem:[#allocation7 + $0x58] sm:$0xff]  ;;  %v368_v54 = vld [vmem:[#allocation7 + $0x150] sm:$0xff]  ;;  %v1089_v55 = vpack.c.bf16 %v385_v48, %v384_v47  ;;  %v355_v58 = vld [vmem:[#allocation7 + $0xe8] sm:$0xff] }
  0x76   :  { %1078 = vmatprep.subr.bf16.mxu1 %v1077_v20  ;;  %v369_v56 = vld [vmem:[#allocation7 + $0x158] sm:$0xff]  ;;  %v386_v59 = vld [vmem:[#allocation7 + $0x1e0] sm:$0xff]  ;;  %v387_v60 = vld [vmem:[#allocation7 + $0x1e8] sm:$0xff]  ;;  %v1059_v61 = vpack.c.bf16 %v337_v53, %v336_v52  ;;  %v1061_v63 = vpack.c.bf16 %v355_v58, %v354_v57 }
  0x77   :  { %v1091_v62 = vpack.c.bf16 %v369_v56, %v368_v54  ;;  %v1093_v1 = vpack.c.bf16 %v387_v60, %v386_v59  ;;  %v338_v2 = vld [vmem:[#allocation7 + $0x60] sm:$0xff]  ;;  %v339_v3 = vld [vmem:[#allocation7 + $0x68] sm:$0xff]  ;;  %v356_v8 = vld [vmem:[#allocation7 + $0xf0] sm:$0xff] }
  0x78   :  { %1048 = vmatpush3.bf16.msra.mxu0 %v1047_v25  ;;  %v370_v4 = vld [vmem:[#allocation7 + $0x160] sm:$0xff]  ;;  %v1063_v5 = vpack.c.bf16 %v339_v3, %v338_v2  ;;  %v371_v6 = vld [vmem:[#allocation7 + $0x168] sm:$0xff]  ;;  %v357_v9 = vld [vmem:[#allocation7 + $0xf8] sm:$0xff] }
  0x79   :  { %1080 = vmatpush3.bf16.msra.mxu1 %v1079_v26  ;;  %1050 = vmatprep.subr.bf16.mxu0 %v1049_v27  ;;  %v1095_v7 = vpack.c.bf16 %v371_v6, %v370_v4  ;;  %v388_v10 = vld [vmem:[#allocation7 + $0x1f0] sm:$0xff]  ;;  %v1065_v11 = vpack.c.bf16 %v357_v9, %v356_v8  ;;  %v389_v12 = vld [vmem:[#allocation7 + $0x1f8] sm:$0xff]  ;;  %v549_v20 = vld [vmem:[#allocation8] sm:$0xff]  ;;  %v147_v26 = vsub.s32 2, %v138_v24  ;;  %v143_v27 = vsub.s32 1, %v138_v24 }
  0x7a   :  { %1082 = vmatprep.subr.bf16.mxu1 %v1081_v31  ;;  %v340_v13 = vld [vmem:[#allocation7 + $0x70] sm:$0xff]  ;;  %v341_v14 = vld [vmem:[#allocation7 + $0x78] sm:$0xff]  ;;  %v1097_v15 = vpack.c.bf16 %v389_v12, %v388_v10  ;;  %v550_v21 = vld [vmem:[#allocation8 + $0x8] sm:$0xff] }
  0x7b   :  { %v1067_v16 = vpack.c.bf16 %v341_v14, %v340_v13  ;;  %v372_v17 = vld [vmem:[#allocation7 + $0x170] sm:$0xff]  ;;  %v373_v18 = vld [vmem:[#allocation7 + $0x178] sm:$0xff]  ;;  %v1101_v22 = vpack.c.bf16 %v550_v21, %v549_v20  ;;  %v554_v56 = vld [vmem:[#allocation8 + $0x28] sm:$0xff] }
  0x7c   :  { %1052 = vmatpush3.bf16.msra.mxu0 %v1051_v37  ;;  %v1099_v19 = vpack.c.bf16 %v373_v18, %v372_v17  ;;  %v135_v25 = vld [vmem:[%s1491_s2] sm:$0xf]  ;;  %v552_v41 = vld [vmem:[#allocation8 + $0x18] sm:$0xff]  ;;  %v557_v3 = vld [vmem:[#allocation8 + $0x40] sm:$0xff] }
  0x7d   :  { %1084 = vmatpush3.bf16.msra.mxu1 %v1083_v38  ;;  %1054 = vmatprep.subr.bf16.mxu0 %v1053_v39  ;;  %v140_v29 = vrot.slane %v135_v25, %v139_v0  ;;  %v148_v30 = vrot.slane %v135_v25, %v147_v26  ;;  %v144_v31 = vrot.slane %v135_v25, %v143_v27  ;;  %v551_v40 = vld [vmem:[#allocation8 + $0x10] sm:$0xff]  ;;  %v558_v4 = vld [vmem:[#allocation8 + $0x48] sm:$0xff]  ;;  %v561_v9 = vld [vmem:[#allocation8 + $0x60] sm:$0xff] }
  0x7e   :  { %1086 = vmatprep.subr.bf16.mxu1 %v1085_v43  ;;  %v152_v32 = vrot.slane %v135_v25, %v151_v28  ;;  %v559_v6 = vld [vmem:[#allocation8 + $0x50] sm:$0xff]  ;;  %v562_v10 = vld [vmem:[#allocation8 + $0x68] sm:$0xff]  ;;  %v564_v13 = vld [vmem:[#allocation8 + $0x78] sm:$0xff] }
  0x7f   :  { %v563_v12 = vld [vmem:[#allocation8 + $0x70] sm:$0xff]  ;;  %v653_v21 = vld [vmem:[#allocation10 + $0x20] sm:$0xff]  ;;  %v656_v0 = vld [vmem:[#allocation10 + $0x38] sm:$0xff] }
  0x80   :  { %1056 = vmatpush3.bf16.msra.mxu0 %v1055_v49  ;;  %v1129_v14 = vpack.c.bf16 %v564_v13, %v563_v12  ;;  %v651_v17 = vld [vmem:[#allocation10 + $0x10] sm:$0xff]  ;;  %v657_v26 = vld [vmem:[#allocation10 + $0x40] sm:$0xff]  ;;  %v658_v27 = vld [vmem:[#allocation10 + $0x48] sm:$0xff] }
  0x81   :  { %1088 = vmatpush3.bf16.msra.mxu1 %v1087_v50  ;;  %1058 = vmatprep.subr.bf16.mxu0 %v1057_v51  ;;  %v1105_v51 = vpack.c.bf16 %v552_v41, %v551_v40  ;;  %v655_v24 = vld [vmem:[#allocation10 + $0x30] sm:$0xff]  ;;  %v1149_v28 = vpack.c.bf16 %v658_v27, %v657_v26 }
  0x82   :  { %1090 = vmatprep.subr.bf16.mxu1 %v1089_v55  ;;  %v553_v55 = vld [vmem:[#allocation8 + $0x20] sm:$0xff]  ;;  %v1145_v25 = vpack.c.bf16 %v656_v0, %v655_v24 }
  0x84   :  { %1060 = vmatpush3.bf16.msra.mxu0 %v1059_v61 }
  0x85   :  { %1092 = vmatpush3.bf16.msra.mxu1 %v1091_v62  ;;  %1062 = vmatprep.subr.bf16.mxu0 %v1061_v63  ;;  %v1109_v62 = vpack.c.bf16 %v554_v56, %v553_v55  ;;  %v555_v63 = vld [vmem:[#allocation8 + $0x30] sm:$0xff]  ;;  %v664_v55 = vld [vmem:[#allocation10 + $0x78] sm:$0xff] }
  0x86   :  { %1094 = vmatprep.subr.bf16.mxu1 %v1093_v1  ;;  %v556_v1 = vld [vmem:[#allocation8 + $0x38] sm:$0xff] }
  0x87   :  { %v1113_v2 = vpack.c.bf16 %v556_v1, %v555_v63  ;;  %v822_v1 = vld [vmem:[%s1497_s8] ss:$0 sm:$0xff] }
  0x88   :  { %1064 = vmatpush3.bf16.msra.mxu0 %v1063_v5  ;;  %v1117_v5 = vpack.c.bf16 %v558_v4, %v557_v3 }
  0x89   :  { %1096 = vmatpush3.bf16.msra.mxu1 %v1095_v7  ;;  %1066 = vmatprep.subr.bf16.mxu0 %v1065_v11  ;;  %v560_v7 = vld [vmem:[#allocation8 + $0x58] sm:$0xff]  ;;  %v1125_v11 = vpack.c.bf16 %v562_v10, %v561_v9 }
  0x8a   :  { %1098 = vmatprep.subr.bf16.mxu1 %v1097_v15  ;;  %v1121_v8 = vpack.c.bf16 %v560_v7, %v559_v6  ;;  %v649_v15 = vld [vmem:[#allocation10] sm:$0xff] }
  0x8c   :  { %1068 = vmatpush3.bf16.msra.mxu0 %v1067_v16  ;;  %v650_v16 = vld [vmem:[#allocation10 + $0x8] sm:$0xff] }
  0x8d   :  { %1100 = vmatpush3.bf16.msra.mxu1 %v1099_v19  ;;  %1102 = vmatprep.subr.bf16.mxu0 %v1101_v22  ;;  %v1133_v18 = vpack.c.bf16 %v650_v16, %v649_v15  ;;  %v652_v19 = vld [vmem:[#allocation10 + $0x18] sm:$0xff] }
  0x8e   :  { %v1137_v20 = vpack.c.bf16 %v652_v19, %v651_v17 }
  0x8f   :  { %1134 = vmatprep.subr.bf16.mxu1 %v1133_v18 }
 0x141   :  { %v230_v33 = vpop.f32.mrb[0].mxu0 }
 0x142   :  { %v231_v34 = vadd.f32 %v230_v33, %v140_v29  ;;  %v307_v35 = vpop.f32.mrb[0].mxu1  ;;  %v232_v36 = vpop.f32.mrb[1].mxu0  ;;  %v662_v33 = vld [vmem:[#allocation10 + $0x68] sm:$0xff] }
 0x143   :  { %v308_v37 = vadd.f32 %v307_v35, %v148_v30  ;;  %v233_v38 = vadd.f32 %v232_v36, %v144_v31  ;;  %v309_v39 = vpop.f32.mrb[1].mxu1 }
 0x144   :  { %v310_v42 = vadd.f32 %v309_v39, %v152_v32  ;;  %v318_v46 = vmax.f32 %v231_v34, 0.0 }
 0x145   :  { %v320_v43 = vmax.f32 %v308_v37, 0.0  ;;  %v319_v44 = vmax.f32 %v233_v38, 0.0  ;;  %v236_v45 = vpop.f32.mrb[2].mxu0  ;;  %v820_v37 = vld [vmem:[%s1493_s4] ss:$0 sm:$0xff] }
 0x146   :  { %v321_v47 = vmax.f32 %v310_v42, 0.0  ;;  %v237_v48 = vadd.f32 %v236_v45, %v140_v29  ;;  %v313_v49 = vpop.f32.mrb[2].mxu1  ;;  %v238_v50 = vpop.f32.mrb[3].mxu0  ;;  %v659_v29 = vld [vmem:[#allocation10 + $0x50] sm:$0xff] }
 0x147   :  { %v314_v52 = vadd.f32 %v313_v49, %v148_v30  ;;  %v239_v53 = vadd.f32 %v238_v50, %v144_v31  ;;  %v315_v54 = vpop.f32.mrb[3].mxu1  ;;  %461 = vmatprep.mubr.f32.mxu0 %v319_v44  ;;  %v660_v30 = vld [vmem:[#allocation10 + $0x58] sm:$0xff] }
 0x148   :  { %v316_v57 = vadd.f32 %v315_v54, %v152_v32  ;;  %536 = vmatprep.mubr.f32.mxu1 %v321_v47  ;;  %462 = vmatmul.mubr.f32.vlgmr.msra.gmra.mrb[4].mxu0 %v318_v46  ;;  %v322_v60 = vmax.f32 %v237_v48, 0.0  ;;  %v1153_v31 = vpack.c.bf16 %v660_v30, %v659_v29  ;;  %v661_v32 = vld [vmem:[#allocation10 + $0x60] sm:$0xff]  ;;  %v663_v54 = vld [vmem:[#allocation10 + $0x70] sm:$0xff] }
 0x149   :  { %v324_v58 = vmax.f32 %v314_v52, 0.0  ;;  %v323_v59 = vmax.f32 %v239_v53, 0.0  ;;  %537 = vmatmul.mubr.f32.vlgmr.msra.gmra.mrb[4].mxu1 %v320_v43  ;;  %1104 = vmatpush3.bf16.msra.mxu0 %v1101_v22  ;;  %v654_v22 = vld [vmem:[#allocation10 + $0x28] sm:$0xff]  ;;  %v1157_v34 = vpack.c.bf16 %v662_v33, %v661_v32  ;;  %v1161_v56 = vpack.c.bf16 %v664_v55, %v663_v54 }
 0x14a   :  { %v325_v61 = vmax.f32 %v316_v57, 0.0  ;;  %1106 = vmatprep.subr.bf16.mxu0 %v1105_v51  ;;  %1136 = vmatpush3.bf16.msra.mxu1 %v1133_v18  ;;  %v1141_v23 = vpack.c.bf16 %v654_v22, %v653_v21  ;;  %v821_v57 = vld [vmem:[%s1495_s6] ss:$0 sm:$0xff]  ;;  %s1334_s6 = smov [#allocation11]  }
 0x14b   :  { %466 = vmatprep.mubr.f32.mxu0 %v323_v59  ;;  %1138 = vmatprep.subr.bf16.mxu1 %v1137_v20  ;;  %s805_s8 = sshll.u32 %s1334_s6, 4  ;;  %s806_s8 = int_to_ptr.vmem [resolvable:$true] %s805_s8 }
 0x14c   :  { %541 = vmatprep.mubr.f32.mxu1 %v325_v61  ;;  %467 = vmatmul.mubr.f32.gmra.mrb[6].mxu0 %v322_v60  ;;  %s1294_s11 = scalar_lea.vmem %s806_s8, 128  ;;  %p1299_p13 = scmp.lt.s32.totalorder %s806_s8, %s806_s8 }
 0x14d   :  { %542 = vmatmul.mubr.f32.gmra.mrb[6].mxu1 %v324_v58  ;;  %1108 = vmatpush3.bf16.msra.mxu0 %v1105_v51  ;;  %p1295_p12 = scmp.ne.s32.totalorder %s806_s8, %s1294_s11  ;;  %p1300_p0 = scmp.lt.s32.totalorder %s1294_s11, %s1294_s11 }
 0x14e   :  { %1110 = vmatprep.subr.bf16.mxu0 %v1109_v62  ;;  %1140 = vmatpush3.bf16.msra.mxu1 %v1137_v20 }
 0x14f   :  { %1142 = vmatprep.subr.bf16.mxu1 %v1141_v23  ;;  %p1301_p1 = por %p1300_p0, %p1299_p13 }
 0x151   :  { %1112 = vmatpush3.bf16.msra.mxu0 %v1109_v62  ;;  %p1302_p2 = pnand %p1301_p1, %p1295_p12 }
 0x152   :  { %1114 = vmatprep.subr.bf16.mxu0 %v1113_v2  ;;  %1144 = vmatpush3.bf16.msra.mxu1 %v1141_v23 }
 0x153   :  { %1146 = vmatprep.subr.bf16.mxu1 %v1145_v25 }
 0x155   :  { %1116 = vmatpush3.bf16.msra.mxu0 %v1113_v2 }
 0x156   :  { %1118 = vmatprep.subr.bf16.mxu0 %v1117_v5  ;;  %1148 = vmatpush3.bf16.msra.mxu1 %v1145_v25 }
 0x157   :  { %1150 = vmatprep.subr.bf16.mxu1 %v1149_v28 }
 0x159   :  { %1120 = vmatpush3.bf16.msra.mxu0 %v1117_v5 }
 0x15a   :  { %1122 = vmatprep.subr.bf16.mxu0 %v1121_v8  ;;  %1152 = vmatpush3.bf16.msra.mxu1 %v1149_v28 }
 0x15b   :  { %1154 = vmatprep.subr.bf16.mxu1 %v1153_v31 }
 0x15d   :  { %1124 = vmatpush3.bf16.msra.mxu0 %v1121_v8 }
 0x15e   :  { %1126 = vmatprep.subr.bf16.mxu0 %v1125_v11  ;;  %1156 = vmatpush3.bf16.msra.mxu1 %v1153_v31 }
 0x15f   :  { %1158 = vmatprep.subr.bf16.mxu1 %v1157_v34 }
 0x161   :  { %1128 = vmatpush3.bf16.msra.mxu0 %v1125_v11 }
 0x162   :  { %1130 = vmatprep.subr.bf16.mxu0 %v1129_v14  ;;  %1160 = vmatpush3.bf16.msra.mxu1 %v1157_v34 }
 0x163   :  { %1162 = vmatprep.subr.bf16.mxu1 %v1161_v56 }
 0x165   :  { %1132 = vmatpush3.bf16.msra.mxu0 %v1129_v14 }
 0x166   :  { %1164 = vmatpush3.bf16.msra.mxu1 %v1161_v56 }
 0x21b   :  { %v855_v35 = vpop.f32.mrb[4].mxu0 }
 0x21c   :  { %v893_v36 = vpop.f32.mrb[4].mxu1  ;;  %v856_v38 = vpop.f32.mrb[5].mxu0 }
 0x21d   :  { %v857_v39 = vadd.f32 %v856_v38, %v855_v35  ;;  %v894_v40 = vpop.f32.mrb[5].mxu1 }
 0x21e   :  { %v895_v41 = vadd.f32 %v894_v40, %v893_v36 }
 0x21f   :  { %v464_v42 = vadd.f32 %v857_v39, %v820_v37  ;;  %v858_v43 = vpop.f32.mrb[6].mxu0 }
 0x220   :  { %v896_v44 = vpop.f32.mrb[6].mxu1  ;;  %v859_v45 = vpop.f32.mrb[7].mxu0 }
 0x221   :  { %v539_v46 = vadd.f32 %v895_v41, %v464_v42  ;;  %v860_v47 = vadd.f32 %v859_v45, %v858_v43  ;;  %v897_v48 = vpop.f32.mrb[7].mxu1 }
 0x222   :  { %v898_v49 = vadd.f32 %v897_v48, %v896_v44 }
 0x223   :  { %v547_v50 = vmax.f32 %v539_v46, 0.0  ;;  %v469_v51 = vadd.f32 %v860_v47, %v820_v37 }
 0x225   :  { %v544_v52 = vadd.f32 %v898_v49, %v469_v51  ;;  %967 = vmatprep.mubr.f32.mxu0 %v547_v50 }
 0x227   :  { %v548_v53 = vmax.f32 %v544_v52, 0.0 }
 0x229   :  { %968 = vmatmul.mubr.f32.vlgmr.msra.gmra.mrb[8].mxu0 %v548_v53 }
 0x2fc   :  { %v969_v58 = vpop.f32.mrb[8].mxu0 }
 0x2fd   :  { %v644_v59 = vadd.f32 %v969_v58, %v821_v57  ;;  %v638_v60 = vpop.f32.mrb[9].mxu0 }
 0x2fe   :  { %v639_v61 = vadd.f32 %v821_v57, %v638_v60 }
 0x2ff   :  { %v648_v63 = vmax.f32 %v644_v59, 0.0 }
 0x300   :  { %v647_v62 = vmax.f32 %v639_v61, 0.0 }
 0x302   :  { %1002 = vmatprep.mubr.f32.mxu1 %v647_v62 }
 0x303   :  { %1003 = vmatmul.mubr.f32.vlgmr.msra.gmra.mrb[8].mxu1 %v648_v63 }
 0x3d6   :  { %v1004_v2 = vpop.f32.mrb[8].mxu1 }
 0x3d7   :  { %v738_v3 = vpop.f32.mrb[9].mxu1  ;;  %v744_v5 = vadd.f32 %v1004_v2, %v822_v1 }
 0x3d8   :  { %v739_v4 = vadd.f32 %v822_v1, %v738_v3 }
 0x3da   :  { %747 = vmax.xlane.f32.xlu0 %v739_v4 }
 0x3de   :  { %749 = vmax.xlane.f32.xlu0 %v744_v5 }
 0x467   :  { %v748_v6 = vpop.xlane.xlu0 %747 }
 0x468   :  { %v751_v7 = vsub.f32 %v739_v4, %v748_v6 }
 0x46a   :  { %v753_v8 = vmul.f32 1.442695, %v751_v7 }
 0x46b   :  { %v750_v9 = vpop.xlane.xlu0 %749 }
 0x46c   :  { %1176 = vpow2.f32 %v753_v8  ;;  %v752_v10 = vsub.f32 %v744_v5, %v750_v9 }
 0x46e   :  { %v755_v11 = vmul.f32 1.442695, %v752_v10 }
 0x470   :  { %1178 = vpow2.f32 %v755_v11 }
 0x476   :  { %v1177_v12 = vpop.eup %1176 }
 0x477   :  { %757 = vadd.xlane.f32.xlu1 %v1177_v12 }
 0x47a   :  { %v1179_v13 = vpop.eup %1178 }
 0x47b   :  { %759 = vadd.xlane.f32.xlu1 %v1179_v13 }
 0x504   :  { %v758_v14 = vpop.xlane.xlu1 %757 }
 0x505   :  { %1180 = vrcp.f32 %v758_v14 }
 0x508   :  { %v760_v15 = vpop.xlane.xlu1 %759 }
 0x509   :  { %1182 = vrcp.f32 %v760_v15 }
 0x50f   :  { %v1181_v16 = vpop.eup %1180 }
 0x510   :  { %v763_v17 = vmul.f32 %v1181_v16, %v1177_v12 }
 0x512   :  { %765 = vxpose.xlu0.b32.start [1/2] (short) (narrow) %v763_v17, 8 }
 0x513   :  { %v1183_v18 = vpop.eup %1182 }
 0x514   :  { %v764_v19 = vmul.f32 %v1183_v18, %v1179_v13 }
 0x516   :  { %766 = vxpose.xlu0.b32.end [2/2] (short) (narrow) %v764_v19, 8 }
 0x592   :  { %v781_v20 = vpop.trf.xlu0 }
 0x593   :  { %798 = vst.msk [vmem:[#allocation11] sm:$0xff] %vm797_vm1, %v781_v20 }
 0x594   :  { %1305 = shalt.err (!%p1302_p2)
}
 0x595   :  { %s1306_s1 = scalar_lea.hbm %s1498_s9, 128 }
 0x596   :  { %p1307_p3 = scmp.ne.s32.totalorder %s1498_s9, %s1306_s1  ;;  %p1310_p4 = scmp.lt.u32.totalorder %s1306_s1, %s1498_s9 }
 0x598   :  { %p1312_p5 = pnand %p1310_p4, %p1307_p3 }
 0x59a   :  { %1315 = shalt.err (!%p1312_p5)
}
 0x59b   :  { %808 = dma.vmem_to_hbm [thread:$0]  %s806_s8, 128, %s1498_s9, [#allocation4]  }
 0x59c   :  { %1322 = dma.done.wait [#allocation4], 128  }
 0x59d   :  { %1323 = vsyncadd [#allocation4], 4294967168 }
 0x59e   :  { %812 = vsyncpa [#allocation3], 1 }
 0x59f   :  { %813 = vsyncpa [#allocation6], 1 }
 0x5a0   :  { %814 = vsyncpa [#allocation9], 1 }
 0x5a1   :  { %815 = vsyncpa [#allocation4], 1 }

</bundles_post_ra>
